<compile_context>
chip_gen: v5e
topology: v5e:2x2
jax: 0.10.0
libtpu: 0.0.40
codegen_flags: <defaults>
</compile_context>

<pallas_src>
import functools

import jax
import jax.numpy as jnp
from jax import lax
from jax.experimental import pallas as pl
from jax.experimental.pallas import tpu as pltpu


def _lmc_kernel(logp_ref, tgt_ref, msk_ref, out_ref, acc_ref, *, row_tile, n_rows):
    t = pl.program_id(1)

    @pl.when(t == 0)
    def _init():
        acc_ref[...] = jnp.zeros_like(acc_ref)

    # Unclamped global tile index -> first global row covered by this grid step.
    # (Clamped duplicate tiles beyond the last real tile get row0 >= n_rows and
    #  are discarded by the validity select below.)
    tile_idx = pl.program_id(0) * pl.num_programs(1) + t
    row0 = tile_idx * row_tile

    logp = logp_ref[...]        # (TR, V) native dtype (bf16 stays packed)
    tgt = tgt_ref[...]          # (TR, 1) int32
    msk = msk_ref[...]          # (TR, 1) f32

    # Gather logp[r, tgt[r]] via compare + select + lane reduce.  The lane reduce is
    # done in the native dtype (exact: exactly one nonzero lane per row) and only the
    # (TR, 1) result is upcast to f32, keeping the bf16 tile packed on the VPU.
    vocab_ids = lax.broadcasted_iota(jnp.int32, logp.shape, 1)
    sel = jnp.where(vocab_ids == tgt, logp, jnp.zeros((), logp.dtype))
    gathered = jnp.sum(sel, axis=-1, keepdims=True).astype(jnp.float32)   # (TR, 1)

    # Row-validity select: ragged / fully-out-of-range tiles contribute 0
    # (select, not multiply, so garbage NaN/Inf rows can't leak through).
    row_ids = row0 + lax.broadcasted_iota(jnp.int32, (row_tile, 1), 0)
    contrib = jnp.where(row_ids < n_rows, -gathered * msk, jnp.float32(0.0))

    acc_ref[...] += contrib

    @pl.when(t == pl.num_programs(1) - 1)
    def _finalize():
        out_ref[...] = jnp.sum(acc_ref[...], axis=(0, 1), keepdims=True)


def _tpu_generation():
    """Returns (vmem_capacity_bytes, tensorcores_per_device); conservative fallbacks."""
    kind = ""
    try:
        kind = jax.devices()[0].device_kind.lower()
    except Exception:
        pass
    is_v7 = ("v7" in kind) or ("tpu7" in kind)
    vmem_cap = None
    try:
        vmem_cap = int(pltpu.get_tpu_info().vmem_capacity_bytes)
    except Exception:
        pass
    if vmem_cap is None:
        vmem_cap = (64 << 20) if is_v7 else (128 << 20)
    num_cores = 2 if is_v7 else 1
    return vmem_cap, num_cores


def _choose_row_tile(n_rows, vocab, itemsize, sub, budget_bytes):
    """Largest row tile (multiple of `sub`) whose total per-row VMEM cost fits budget."""
    v_pad = max(128, ((vocab + 127) // 128) * 128)
    per_row = 2 * v_pad * itemsize       # double-buffered logp tile
    per_row += 2 * 2 * 128 * 4           # double-buffered (TR,1) tgt+msk (lane-padded)
    per_row += 128 * 4                   # (TR,1) f32 accumulator (lane-padded)
    rows = budget_bytes // per_row
    rows_needed = ((n_rows + sub - 1) // sub) * sub      # no need to exceed N
    rows = max(sub, min(int(rows), rows_needed))
    return max(sub, (rows // sub) * sub)


def language_model_criterion(inp, target, mask, *, row_tile=None,
                             vmem_budget_bytes=None):
    """Pallas equivalent of LanguageModelCriterion.forward.

    inp:    (B, L, V) float log-probs (any float dtype; streamed as-is, no upcast)
    target: (B, L_t) int indices (L_t >= L)
    mask:   (B, L_m) float mask (L_m >= L)
    returns scalar f32: mean over batch of sum over seq of -inp[b,l,target[b,l]]*mask[b,l]
    """
    B, L, V = inp.shape
    target = target[:, :L]
    mask = mask[:, :L]

    N = B * L
    logp = inp.reshape(N, V)                          # native dtype, no pad / no cast
    tgt = target.reshape(N, 1).astype(jnp.int32)
    msk = mask.reshape(N, 1).astype(jnp.float32)

    itemsize = jnp.dtype(logp.dtype).itemsize
    sub = 8 if itemsize >= 4 else (32 // itemsize)    # sublane packing granularity

    vmem_cap, num_cores = _tpu_generation()
    small_vmem = vmem_cap <= (96 << 20)               # v7x-class (64 MiB / TC)
    if vmem_budget_bytes is None:
        vmem_budget_bytes = (20 << 20) if small_vmem else (44 << 20)
    limit_cap = (48 << 20) if small_vmem else (100 << 20)

    if row_tile is None:
        row_tile = _choose_row_tile(N, V, itemsize, sub, vmem_budget_bytes)
    else:
        row_tile = max(sub, (int(row_tile) // sub) * sub)

    tiles_total = pl.cdiv(N, row_tile)
    # 2 shards only where there are 2 TensorCores (v7x); serial loop elsewhere.
    num_shards = 2 if (num_cores >= 2 and tiles_total > 1) else 1
    tiles_per_shard = pl.cdiv(tiles_total, num_shards)

    # VMEM: double-buffered logp tile + per-tile tgt/msk blocks + accumulator + slack.
    v_pad = max(128, ((V + 127) // 128) * 128)
    need = (2 * row_tile * v_pad * itemsize
            + 2 * 2 * row_tile * 128 * 4
            + row_tile * 128 * 4
            + (2 << 20))
    vmem_limit = int(min(max(need, 16 << 20), limit_cap))
    vmem_limit = max(vmem_limit, int(need))           # never clamp below actual need

    kernel = functools.partial(_lmc_kernel, row_tile=row_tile, n_rows=N)

    tps = tiles_per_shard
    last_tile = tiles_total - 1

    def row_index_map(p, t):
        # Clamp fully-out-of-range tiles (possible when num_shards doesn't divide
        # tiles_total); their rows are discarded by the in-kernel validity select.
        return (jnp.minimum(p * tps + t, last_tile), 0)

    out = pl.pallas_call(
        kernel,
        out_shape=jax.ShapeDtypeStruct((num_shards, 1), jnp.float32),
        grid_spec=pltpu.PrefetchScalarGridSpec(
            num_scalar_prefetch=0,
            grid=(num_shards, tiles_per_shard),
            in_specs=[
                pl.BlockSpec((row_tile, V), row_index_map),   # streamed logp tile
                pl.BlockSpec((row_tile, 1), row_index_map),   # per-tile target
                pl.BlockSpec((row_tile, 1), row_index_map),   # per-tile mask
            ],
            out_specs=pl.BlockSpec((1, 1), lambda p, t: (p, 0)),
            scratch_shapes=[pltpu.VMEM((row_tile, 1), jnp.float32)],
        ),
        compiler_params=pltpu.CompilerParams(
            dimension_semantics=("parallel", "arbitrary"),
            vmem_limit_bytes=vmem_limit,
        ),
        cost_estimate=pl.CostEstimate(
            flops=N * V,              # compare/select, not a matmul — schedule as mem-bound
            transcendentals=0,
            bytes_accessed=N * V * itemsize + 2 * N * 4 + num_shards * 4,
        ),
    )(logp, tgt, msk)

    # Combine per-shard partial sums; mean over batch.
    return jnp.sum(out) / jnp.float32(B)


def _reference(inp, target, mask):
    B, L, V = inp.shape
    target = target[:, :L]
    mask = mask[:, :L]
    gathered = jnp.take_along_axis(inp, target[..., None], axis=-1)[..., 0]
    out = (-gathered * mask).sum(-1)
    return jnp.mean(out)


if __name__ == "__main__":
    # --- test 1: small f32, single tile / single shard ---
    key = jax.random.PRNGKey(0)
    k1, k2, k3 = jax.random.split(key, 3)

    B, L, V = 2, 8, 32           # batch, seq length of logits, vocab
    L_full = 10                  # target/mask are longer and get cropped to L

    logits = jax.random.normal(k1, (B, L, V), dtype=jnp.float32)
    inp = jax.nn.log_softmax(logits, axis=-1)                     # (B, L, V) log-probs
    target = jax.random.randint(k2, (B, L_full), 0, V, dtype=jnp.int32)
    mask = (jax.random.uniform(k3, (B, L_full)) > 0.3).astype(jnp.float32)

    out = jax.block_until_ready(language_model_criterion(inp, target, mask))
    ref = jax.block_until_ready(_reference(inp, target, mask))
    assert jnp.allclose(out, ref, atol=1e-5, rtol=1e-5), (out, ref)

    # --- test 2: bf16 input, ragged last tile, multi-tile grid (forced small tile) ---
    k4, k5, k6 = jax.random.split(jax.random.PRNGKey(1), 3)
    B2, L2, V2 = 4, 100, 512
    logits2 = jax.random.normal(k4, (B2, L2, V2), dtype=jnp.float32)
    inp2 = jax.nn.log_softmax(logits2, axis=-1).astype(jnp.bfloat16)
    target2 = jax.random.randint(k5, (B2, L2 + 3), 0, V2, dtype=jnp.int32)
    mask2 = (jax.random.uniform(k6, (B2, L2 + 3)) > 0.2).astype(jnp.float32)

    out2 = jax.block_until_ready(
        language_model_criterion(inp2, target2, mask2, row_tile=64))
    ref2 = jax.block_until_ready(_reference(inp2, target2, mask2))
    assert jnp.allclose(out2, ref2, atol=1e-2, rtol=1e-4), (out2, ref2)

    # --- test 3: same bf16 inputs, auto (generation-aware) tile sizing ---
    out3 = jax.block_until_ready(language_model_criterion(inp2, target2, mask2))
    assert jnp.allclose(out3, ref2, atol=1e-2, rtol=1e-4), (out3, ref2)

    print("KERNEL_OK")
</pallas_src>

<mosaic_0001>
module attributes {stable_mosaic.version = 11 : i64} {
  func.func @_lmc_kernel(%arg0: i32, %arg1: i32, %arg2: memref<16x32xf32, #tpu.memory_space<vmem>>, %arg3: memref<16x1xi32, #tpu.memory_space<vmem>>, %arg4: memref<16x1xf32, #tpu.memory_space<vmem>>, %arg5: memref<1x1xf32, #tpu.memory_space<vmem>>, %arg6: memref<16x1xf32, #tpu.memory_space<vmem>>) attributes {dimension_semantics = [#tpu.dimension_semantics<parallel>, #tpu.dimension_semantics<arbitrary>], iteration_bounds = array<i64: 1, 1>, scalar_prefetch = 0 : i64, scratch_operands = 1 : i64, tpu.core_type = #tpu.core_type<tc>, window_params = [{transform_indices = @transform_0, window_bounds = array<i64: 16, 32>}, {transform_indices = @transform_1, window_bounds = array<i64: 16, 1>}, {transform_indices = @transform_2, window_bounds = array<i64: 16, 1>}, {transform_indices = @transform_3, window_bounds = array<i64: 1, 1>}]} {
    %c0_i32 = arith.constant 0 : i32
    %0 = arith.cmpi eq, %arg1, %c0_i32 : i32
    %1 = arith.extui %0 : i1 to i32
    %c0_i32_0 = arith.constant 0 : i32
    %2 = arith.cmpi ne, %1, %c0_i32_0 : i32
    scf.if %2 {
      %cst_16 = arith.constant 0.000000e+00 : f32
      %32 = vector.broadcast %cst_16 : f32 to vector<16x1xf32>
      %c0_17 = arith.constant 0 : index
      %c0_18 = arith.constant 0 : index
      %33 = vector.load %arg6[%c0_17, %c0_18] : memref<16x1xf32, #tpu.memory_space<vmem>>, vector<16x1xf32>
      tpu.vector_store %arg6[%c0_17, %c0_18], %32 {strides = array<i32>} : memref<16x1xf32, #tpu.memory_space<vmem>>, vector<16x1xf32>,
    } else {
    }
    %c1_i32 = arith.constant 1 : i32
    %3 = arith.muli %arg0, %c1_i32 : i32
    %4 = arith.addi %3, %arg1 : i32
    %c16_i32 = arith.constant 16 : i32
    %5 = arith.muli %4, %c16_i32 : i32
    %c0 = arith.constant 0 : index
    %c0_1 = arith.constant 0 : index
    %6 = vector.load %arg2[%c0, %c0_1] : memref<16x32xf32, #tpu.memory_space<vmem>>, vector<16x32xf32>
    %c0_2 = arith.constant 0 : index
    %c0_3 = arith.constant 0 : index
    %7 = vector.load %arg3[%c0_2, %c0_3] : memref<16x1xi32, #tpu.memory_space<vmem>>, vector<16x1xi32>
    %c0_4 = arith.constant 0 : index
    %c0_5 = arith.constant 0 : index
    %8 = vector.load %arg4[%c0_4, %c0_5] : memref<16x1xf32, #tpu.memory_space<vmem>>, vector<16x1xf32>
    %9 = tpu.iota {dimensions = array<i32: 1>} : vector<16x32xi32>
    %10 = vector.broadcast %7 : vector<16x1xi32> to vector<16x32xi32>
    %11 = arith.cmpi eq, %9, %10 : vector<16x32xi32>
    %cst = arith.constant 0.000000e+00 : f32
    %12 = vector.broadcast %cst : f32 to vector<16x32xf32>
    %13 = arith.select %11, %6, %12 : vector<16x32xi1>, vector<16x32xf32>
    %cst_6 = arith.constant dense<0.000000e+00> : vector<16xf32>
    %14 = vector.multi_reduction <add>, %13, %cst_6 [1] : vector<16x32xf32> to vector<16xf32>
    %15 = vector.shape_cast %14 : vector<16xf32> to vector<16x1xf32>
    %16 = tpu.iota {dimensions = array<i32: 0>} : vector<16x1xi32>
    %17 = vector.broadcast %5 : i32 to vector<16x1xi32>
    %18 = arith.addi %17, %16 : vector<16x1xi32>
    %c16_i32_7 = arith.constant 16 : i32
    %19 = vector.broadcast %c16_i32_7 : i32 to vector<16x1xi32>
    %20 = arith.cmpi slt, %18, %19 : vector<16x1xi32>
    %cst_8 = arith.constant 0.000000e+00 : f32
    %21 = vector.broadcast %cst_8 : f32 to vector<16x1xf32>
    %22 = arith.subf %21, %15 : vector<16x1xf32>
    %23 = arith.mulf %22, %8 : vector<16x1xf32>
    %cst_9 = arith.constant 0.000000e+00 : f32
    %24 = vector.broadcast %cst_9 : f32 to vector<16x1xf32>
    %25 = arith.select %20, %23, %24 : vector<16x1xi1>, vector<16x1xf32>
    %c0_10 = arith.constant 0 : index
    %c0_11 = arith.constant 0 : index
    %26 = vector.load %arg6[%c0_10, %c0_11] : memref<16x1xf32, #tpu.memory_space<vmem>>, vector<16x1xf32>
    %27 = arith.addf %26, %25 : vector<16x1xf32>
    %c0_12 = arith.constant 0 : index
    %c0_13 = arith.constant 0 : index
    %28 = vector.load %arg6[%c0_12, %c0_13] : memref<16x1xf32, #tpu.memory_space<vmem>>, vector<16x1xf32>
    tpu.vector_store %arg6[%c0_12, %c0_13], %27 {strides = array<i32>} : memref<16x1xf32, #tpu.memory_space<vmem>>, vector<16x1xf32>,
    %c0_i32_14 = arith.constant 0 : i32
    %29 = arith.cmpi eq, %arg1, %c0_i32_14 : i32
    %30 = arith.extui %29 : i1 to i32
    %c0_i32_15 = arith.constant 0 : i32
    %31 = arith.cmpi ne, %30, %c0_i32_15 : i32
    scf.if %31 {
      %c0_16 = arith.constant 0 : index
      %c0_17 = arith.constant 0 : index
      %32 = vector.load %arg6[%c0_16, %c0_17] : memref<16x1xf32, #tpu.memory_space<vmem>>, vector<16x1xf32>
      %33 = vector.shape_cast %32 : vector<16x1xf32> to vector<1x16x1xf32>
      %cst_18 = arith.constant dense<0.000000e+00> : vector<1xf32>
      %34 = vector.multi_reduction <add>, %33, %cst_18 [1, 2] : vector<1x16x1xf32> to vector<1xf32>
      %35 = vector.shape_cast %34 : vector<1xf32> to vector<1x1x1xf32>
      %36 = vector.extract %35[0, 0, 0] : f32 from vector<1x1x1xf32>
      %37 = vector.broadcast %36 : f32 to vector<1x1xf32>
      %c0_19 = arith.constant 0 : index
      %c0_20 = arith.constant 0 : index
      %38 = vector.load %arg5[%c0_19, %c0_20] : memref<1x1xf32, #tpu.memory_space<vmem>>, vector<1x1xf32>
      tpu.vector_store %arg5[%c0_19, %c0_20], %37 {strides = array<i32>} : memref<1x1xf32, #tpu.memory_space<vmem>>, vector<1x1xf32>,
    } else {
    }
    return
  }
  func.func @transform_0(%arg0: i32, %arg1: i32) -> (i32, i32) {
    %c1_i32 = arith.constant 1 : i32
    %0 = arith.muli %arg0, %c1_i32 : i32
    %1 = arith.addi %0, %arg1 : i32
    %c0_i32 = arith.constant 0 : i32
    %2 = arith.minsi %1, %c0_i32 : i32
    %c0_i32_0 = arith.constant 0 : i32
    %c0_i32_1 = arith.constant 0 : i32
    return %2, %c0_i32_0 : i32, i32
  }
  func.func @transform_1(%arg0: i32, %arg1: i32) -> (i32, i32) {
    %c1_i32 = arith.constant 1 : i32
    %0 = arith.muli %arg0, %c1_i32 : i32
    %1 = arith.addi %0, %arg1 : i32
    %c0_i32 = arith.constant 0 : i32
    %2 = arith.minsi %1, %c0_i32 : i32
    %c0_i32_0 = arith.constant 0 : i32
    %c0_i32_1 = arith.constant 0 : i32
    return %2, %c0_i32_0 : i32, i32
  }
  func.func @transform_2(%arg0: i32, %arg1: i32) -> (i32, i32) {
    %c1_i32 = arith.constant 1 : i32
    %0 = arith.muli %arg0, %c1_i32 : i32
    %1 = arith.addi %0, %arg1 : i32
    %c0_i32 = arith.constant 0 : i32
    %2 = arith.minsi %1, %c0_i32 : i32
    %c0_i32_0 = arith.constant 0 : i32
    %c0_i32_1 = arith.constant 0 : i32
    return %2, %c0_i32_0 : i32, i32
  }
  func.func @transform_3(%arg0: i32, %arg1: i32) -> (i32, i32) {
    %c0_i32 = arith.constant 0 : i32
    %c0_i32_0 = arith.constant 0 : i32
    return %arg0, %c0_i32 : i32, i32
  }
}

</mosaic_0001>

<bundles_post_ra>
// kernel: tpu_custom_call.1
= control target key start
LH: loop header
LB: loop body
LE: loop exit
PB: predicated region body
PF: predicated region fallthrough
CT: control target
= control target key end

     0   :  { %s302_s0 = inlined_call_operand.vmem [shape: f32[16,32], index: 0, kind: input, shape index: {}]   ;;  %s303_s1 = inlined_call_operand.vmem [shape: s32[16,1], index: 1, kind: input, shape index: {}]   ;;  %s304_s2 = inlined_call_operand.vmem [shape: f32[16,1], index: 2, kind: input, shape index: {}]   ;;  %s305_s3 = inlined_call_operand.hbm [shape: f32[1,1], index: 3, kind: output, shape index: {}]  }
   0x1   :  { %v122_v0 = vld [vmem:[%s303_s1] sm:$0xff] }
   0x2   :  { %8 = vsyncpa [#allocation4], 0  ;;  %v252_v1 = vmov 0   ;;  %v123_v2 = vld [vmem:[%s303_s1 + $0x8] sm:$0xff]  ;;  %v126_v3 = vlaneseq  ;;  %v120_v5 = vld [vmem:[%s302_s0] sm:$0xff]  ;;  %vm138_vm0 = vcmask 261120  }
   0x3   :  { %225 = vset.pattern.permute.xlu0 %v252_v1  ;;  %v121_v9 = vld [vmem:[%s302_s0 + $0x8] sm:$0xff]  ;;  %vm115_vm3 = vcmask 7168   ;;  %v253_v13 = vmov 0.0   ;;  %v124_v14 = vld [vmem:[%s304_s2] sm:$0xff]  ;;  %s193_s25 = sshll.u32 %s305_s3, 4  ;;  %vm184_vm4 = vcmask 0   ;;  %s194_s25 = int_to_ptr.hbm [resolvable:$true] %s193_s25 }
   0x4   :  { %129 = vperm.xlu0 %225, %v122_v0   ;;  %v127_v4 = vand.u32 127, %v126_v3  ;;  %116 = vst.msk [vmem:[#allocation2] sm:$0xff] %vm115_vm3, %v253_v13  ;;  %v125_v20 = vld [vmem:[%s304_s2 + $0x8] sm:$0xff]  ;;  %s254_s2 = smov [#allocation3]  }
   0x5   :  { %117 = vst.msk [vmem:[#allocation2 + $0x8] sm:$0xff] %vm115_vm3, %v253_v13  ;;  %s191_s22 = sshll.u32 %s254_s2, 4  ;;  %s192_s22 = int_to_ptr.vmem [resolvable:$true] %s191_s22 }
   0xb   :  { %v159_v17 = vld [vmem:[#allocation2] sm:$0xff] }
   0xc   :  { %132 = vperm.xlu0 %225, %v123_v2   ;;  %v160_v23 = vld [vmem:[#allocation2 + $0x8] sm:$0xff] }
  0x76   :  { %v130_v6 = vpop.permute.xlu0 %129 }
  0x77   :  { %vm134_vm1 = vcmp.eq.s32.totalorder %v127_v4, %v130_v6 }
  0x78   :  { %v136_v7 = vsel %vm134_vm1, %v120_v5, 0.0 }
  0x79   :  { %v139_v8 = vsel %vm138_vm0, %v136_v7, 0.0 }
  0x7a   :  { %140 = vadd.xlane.f32.xlu1 %v139_v8 }
  0x7e   :  { %v133_v10 = vpop.permute.xlu0 %132 }
  0x7f   :  { %vm135_vm2 = vcmp.eq.s32.totalorder %v127_v4, %v133_v10 }
  0x80   :  { %v137_v11 = vsel %vm135_vm2, %v121_v9, 0.0 }
  0x81   :  { %v142_v12 = vsel %vm138_vm0, %v137_v11, 0.0 }
  0x82   :  { %143 = vadd.xlane.f32.xlu1 %v142_v12 }
  0xed   :  { %v141_v15 = vpop.xlane.xlu1 %140 }
  0xee   :  { %v153_v16 = vsub.f32 0.0, %v141_v15 }
  0xf0   :  { %v155_v18 = vmul.f32 %v153_v16, %v124_v14 }
  0xf2   :  { %v161_v19 = vadd.f32 %v159_v17, %v155_v18 }
  0xf4   :  { %164 = vst.msk [vmem:[#allocation2] sm:$0xff] %vm115_vm3, %v161_v19 }
  0xf5   :  { %v144_v21 = vpop.xlane.xlu1 %143 }
  0xf6   :  { %v154_v22 = vsub.f32 0.0, %v144_v21 }
  0xf8   :  { %v156_v24 = vmul.f32 %v154_v22, %v125_v20 }
  0xfa   :  { %v162_v25 = vadd.f32 %v160_v23, %v156_v24 }
  0xfb   :  { %v169_v26 = vld [vmem:[#allocation2] sm:$0xff] }
  0xfc   :  { %165 = vst.msk [vmem:[#allocation2 + $0x8] sm:$0xff] %vm115_vm3, %v162_v25  ;;  %v171_v28 = vsel %vm115_vm3, %v169_v26, 0.0 }
 0x103   :  { %v170_v27 = vld [vmem:[#allocation2 + $0x8] sm:$0xff] }
 0x104   :  { %v172_v29 = vsel %vm115_vm3, %v170_v27, 0.0 }
 0x105   :  { %v173_v30 = vadd.f32 %v172_v29, %v171_v28 }
 0x107   :  { %174 = vadd.xlane.f32.xlu2 %v173_v30 }
 0x17a   :  { %v175_v31 = vpop.xlane.xlu2 %174 }
 0x17b   :  { %v176_v32 = vrot.slane %v175_v31, 4 }
 0x17d   :  { %v177_v33 = vadd.f32 %v176_v32, %v175_v31 }
 0x17f   :  { %v178_v34 = vrot.slane %v177_v33, 2 }
 0x181   :  { %v179_v35 = vadd.f32 %v178_v34, %v177_v33 }
 0x183   :  { %v180_v36 = vrot.slane %v179_v35, 1 }
 0x185   :  { %v181_v37 = vadd.f32 %v180_v36, %v179_v35 }
 0x187   :  { %220 = vpush %v181_v37 }
 0x1b8   :  { %s221_s26 = spop %220 }
 0x1b9   :  { %v183_v38 = vstv %s221_s26 }
 0x1ba   :  { %185 = vst.msk [vmem:[#allocation3] sm:$0x1] %vm184_vm4, %v183_v38 }
 0x1bb   :  { %196 = dma.vmem_to_hbm [thread:$0]  %s192_s22, 16, %s194_s25, [#allocation4]  }
 0x1bc   :  { %250 = dma.done.wait [#allocation4], 16  }
 0x1bd   :  { %251 = vsyncadd [#allocation4], 4294967280 }
 0x1be   :  { %201 = vsyncpa [#allocation4], 1 }

</bundles_post_ra>
